<compile_context>
chip_gen: v6e
topology: v6e:2x2x1
jax: 0.10.0
libtpu: 0.0.40
codegen_flags: <defaults>
</compile_context>

<pallas_src>
import functools

import jax
import jax.numpy as jnp
from jax.experimental import pallas as pl
from jax.experimental.pallas import tpu as pltpu


def _attention_energy_kernel(g_ref, gt_ref, wq_ref, wkt_ref, labr_ref,
                             labc_ref, out_ref, *, nheads, qk_dim, seq_len,
                             beta):
    H, Z, K = nheads, qk_dim, seq_len

    # ---- Stage 1: fat projections over all rows of this step (MXU, bf16 in,
    # f32 accumulate).  beta is already folded into wq, so q_all = beta * q.
    q_all = jnp.dot(g_ref[...], wq_ref[...],
                    preferred_element_type=jnp.float32)          # (R, H*Z)
    kt_all = jnp.dot(wkt_ref[...], gt_ref[...],
                     preferred_element_type=jnp.float32)         # (H*Z, R)
    # Stage-2 MXU operands back to bf16 (review item: MXU-native path).
    q_all = q_all.astype(jnp.bfloat16)
    kt_all = kt_all.astype(jnp.bfloat16)

    # ---- Pairwise validity * same-batch mask from the label vectors.
    # label >= 0 : batch id of a valid token; negative : padded token
    # (different sentinels per orientation so padded-vs-padded never matches).
    lab_r = labr_ref[...]                    # (1, R)  keys   (lanes)
    lab_c = labc_ref[...]                    # (R, 1)  queries (sublanes)
    pair = lab_c == lab_r                    # (R, R)
    valid_q = lab_c >= 0.0                   # (R, 1)

    # Reference masks A with -1e6 then multiplies by beta; beta is folded into
    # q here so the fill value is beta * (-1e6).
    fill = jnp.float32(-1.0e6 * beta)
    # A fully padded query row contributes exactly fill + log(K) per head.
    masked_row_lse = fill + jnp.log(jnp.float32(K))

    lse_acc = jnp.zeros(valid_q.shape, jnp.float32)
    for h in range(H):                       # static unroll over heads
        qh = q_all[:, h * Z:(h + 1) * Z]     # (R, Z)  = beta * q_h
        kth = kt_all[h * Z:(h + 1) * Z, :]   # (Z, R)  = k_h^T
        a = jnp.dot(qh, kth, preferred_element_type=jnp.float32)   # beta * A
        a = jnp.where(pair, a, fill)
        m = jnp.max(a, axis=-1, keepdims=True)
        lse = m + jnp.log(jnp.sum(jnp.exp(a - m), axis=-1, keepdims=True))
        # Cross-batch / padded-key entries are `fill`: with any valid key in
        # the row they underflow to exactly 0 inside the sum, so lse equals
        # the per-batch logsumexp.  Fully padded query rows get their exact
        # reference value instead.
        lse_acc = lse_acc + jnp.where(valid_q, lse, masked_row_lse)

    e_step = (-1.0 / beta) * jnp.sum(lse_acc)
    # Single lane/sublane-dense (8,128) store of this step's partial energy.
    out_ref[...] = jnp.full(out_ref.shape, e_step, dtype=out_ref.dtype)


def _batches_per_step(B, K, target_rows=256):
    """Pick batches per grid step: bs divides B; bs*K is a multiple of 128
    whenever there is more than one step (BlockSpec lane constraint on g^T)."""
    if B * K <= target_rows:
        half = B // 2
        if B % 2 == 0 and half > 0 and (half * K) % 128 == 0:
            return half          # keep >= 2 steps for the two v7x TensorCores
        return B                 # one fat step minimises fixed overhead
    cap = max(1, target_rows // K)
    for d in range(cap, 0, -1):
        if B % d == 0 and (d * K) % 128 == 0:
            return d
    return B                     # fall back: single fat step


def attention_energy(g, wq, wk, mask_bool, beta, *, mxu_dtype=jnp.bfloat16,
                     target_rows=256):
    """e = -(1/beta) * sum logsumexp(beta*A, -1) with pairwise padding mask."""
    B, K, D = g.shape
    H, Z, _ = wq.shape
    beta = float(beta)

    bs = _batches_per_step(B, K, target_rows)
    steps = B // bs
    Rs = bs * K                                  # rows per grid step

    # Flattened rows + wrapper-prepared transpose (so k comes out pre-transposed).
    g2 = g.reshape(B * K, D).astype(mxu_dtype)               # (B*K, D)
    gt = jnp.transpose(g2)                                   # (D, B*K)

    # Packed projection weights.  beta folded into Wq.
    wq_f = jnp.transpose(wq * beta, (2, 0, 1)).reshape(D, H * Z).astype(mxu_dtype)
    wk_t = wk.reshape(H * Z, D).astype(mxu_dtype)

    # Per-token labels: batch id if valid, negative sentinel if padded.
    batch_ids = jnp.arange(B, dtype=jnp.float32)[:, None]    # (B, 1)
    lab_row = jnp.where(mask_bool, batch_ids, -2.0).reshape(steps, 1, Rs)
    lab_col = jnp.where(mask_bool, batch_ids, -1.0).reshape(steps, Rs, 1)

    kernel = functools.partial(_attention_energy_kernel, nheads=H, qk_dim=Z,
                               seq_len=K, beta=beta)

    partial_e = pl.pallas_call(
        kernel,
        out_shape=jax.ShapeDtypeStruct((steps, 8, 128), jnp.float32),
        grid_spec=pltpu.PrefetchScalarGridSpec(
            num_scalar_prefetch=0,
            grid=(steps,),
            in_specs=[
                pl.BlockSpec((Rs, D), lambda s: (s, 0)),          # g rows
                pl.BlockSpec((D, Rs), lambda s: (0, s)),          # g^T cols
                pl.BlockSpec((D, H * Z), lambda s: (0, 0)),       # beta*Wq (resident)
                pl.BlockSpec((H * Z, D), lambda s: (0, 0)),       # Wk packed (resident)
                pl.BlockSpec((None, 1, Rs), lambda s: (s, 0, 0)),  # key labels
                pl.BlockSpec((None, Rs, 1), lambda s: (s, 0, 0)),  # query labels
            ],
            out_specs=pl.BlockSpec((None, 8, 128), lambda s: (s, 0, 0)),
        ),
        compiler_params=pltpu.CompilerParams(
            dimension_semantics=("parallel",)),
    )(g2, gt, wq_f, wk_t, lab_row, lab_col)

    # Per-step partial energies (broadcast across the (8,128) block) -> scalar.
    return jnp.sum(partial_e[:, 0, 0])


def attention_energy_reference(g, wq, wk, mask_bool, beta):
    q = jnp.einsum('bkd,hzd->bkhz', g, wq)
    k = jnp.einsum('bkd,hzd->bkhz', g, wk)
    A = jnp.einsum('bqhz,bkhz->bhqk', q, k)
    m = mask_bool[:, None, :, None] & mask_bool[:, None, None, :]
    A = jnp.where(m, A, -1.0e6)
    lse = jax.scipy.special.logsumexp(beta * A, axis=-1)
    return (-1.0 / beta) * jnp.sum(lse)


if __name__ == "__main__":
    # Small shapes consistent with the module: in_dim=32, qk_dim=16, nheads=4.
    B, K, D = 2, 8, 32           # batch, seq, in_dim
    H, Z = 4, 16                 # nheads, qk_dim
    beta = 1.0 / (Z ** 0.5)      # default beta = 1/sqrt(qk_dim)

    key = jax.random.PRNGKey(0)
    kg, kq, kk, kg2 = jax.random.split(key, 4)
    g = jax.random.normal(kg, (B, K, D), dtype=jnp.float32)
    # Deterministic params mirroring torch.normal(0, 0.002, size=(H, Z, D)).
    wq = 0.002 * jax.random.normal(kq, (H, Z, D), dtype=jnp.float32)
    wk = 0.002 * jax.random.normal(kk, (H, Z, D), dtype=jnp.float32)

    # --- check 1: all-valid mask -> tight numerics check (nothing hidden
    #     behind the -1e6 fill constant; exercises the bf16 MXU paths).
    mask_full = jnp.ones((B, K), dtype=jnp.bool_)
    e1 = attention_energy(g, wq, wk, mask_full, beta)
    r1 = attention_energy_reference(g, wq, wk, mask_full, beta)
    jax.block_until_ready((e1, r1))
    assert jnp.allclose(e1, r1, rtol=1e-4, atol=1e-2), (e1, r1)

    # --- check 2: padded mask -> masking semantics (value dominated by fills,
    #     exactly as in the PyTorch module, which sums padded query rows too).
    mask_pad = jnp.array([[True] * 6 + [False] * 2,
                          [True] * 8], dtype=jnp.bool_)
    e2 = attention_energy(g, wq, wk, mask_pad, beta)
    r2 = attention_energy_reference(g, wq, wk, mask_pad, beta)
    jax.block_until_ready((e2, r2))
    assert jnp.allclose(e2, r2, rtol=1e-4, atol=1.0), (e2, r2)

    # --- check 3: larger batch -> multi-step grid (2 steps x 256 rows),
    #     mixed/empty/full padding patterns.
    B3 = 64
    g3 = jax.random.normal(kg2, (B3, K, D), dtype=jnp.float32)
    lengths = jnp.arange(B3) % (K + 1)
    mask3 = jnp.arange(K)[None, :] < lengths[:, None]
    e3 = attention_energy(g3, wq, wk, mask3, beta)
    r3 = attention_energy_reference(g3, wq, wk, mask3, beta)
    jax.block_until_ready((e3, r3))
    assert jnp.allclose(e3, r3, rtol=1e-4, atol=1.0), (e3, r3)

    print("KERNEL_OK")
</pallas_src>

<mosaic_0001>
module attributes {stable_mosaic.version = 11 : i64} {
  func.func @_attention_energy_kernel(%arg0: i32, %arg1: memref<16x32xbf16, #tpu.memory_space<vmem>>, %arg2: memref<32x16xbf16, #tpu.memory_space<vmem>>, %arg3: memref<32x64xbf16, #tpu.memory_space<vmem>>, %arg4: memref<64x32xbf16, #tpu.memory_space<vmem>>, %arg5: memref<1x1x16xf32, #tpu.memory_space<vmem>>, %arg6: memref<1x16x1xf32, #tpu.memory_space<vmem>>, %arg7: memref<1x8x128xf32, #tpu.memory_space<vmem>>) attributes {dimension_semantics = [#tpu.dimension_semantics<parallel>], iteration_bounds = array<i64: 1>, scalar_prefetch = 0 : i64, scratch_operands = 0 : i64, tpu.core_type = #tpu.core_type<tc>, window_params = [{transform_indices = @transform_0, window_bounds = array<i64: 16, 32>}, {transform_indices = @transform_1, window_bounds = array<i64: 32, 16>}, {pipeline_mode = #tpu.pipeline_mode<synchronous>, transform_indices = @transform_2, window_bounds = array<i64: 32, 64>}, {pipeline_mode = #tpu.pipeline_mode<synchronous>, transform_indices = @transform_3, window_bounds = array<i64: 64, 32>}, {transform_indices = @transform_4, window_bounds = array<i64: 1, 1, 16>}, {transform_indices = @transform_5, window_bounds = array<i64: 1, 16, 1>}, {transform_indices = @transform_6, window_bounds = array<i64: 1, 8, 128>}]} {
    %c0 = arith.constant 0 : index
    %c0_0 = arith.constant 0 : index
    %0 = vector.load %arg1[%c0, %c0_0] : memref<16x32xbf16, #tpu.memory_space<vmem>>, vector<16x32xbf16>
    %c0_1 = arith.constant 0 : index
    %c0_2 = arith.constant 0 : index
    %1 = vector.load %arg3[%c0_1, %c0_2] : memref<32x64xbf16, #tpu.memory_space<vmem>>, vector<32x64xbf16>
    %cst = arith.constant dense<0.000000e+00> : vector<16x64xf32>
    %2 = tpu.matmul %0, %1, %cst {dimension_numbers = #tpu.dot_dimension_numbers<[1], [0], [0], [1], [0, 0, 1, 1], [], []>} : vector<16x32xbf16>, vector<32x64xbf16>, vector<16x64xf32> -> vector<16x64xf32>
    %c0_3 = arith.constant 0 : index
    %c0_4 = arith.constant 0 : index
    %3 = vector.load %arg4[%c0_3, %c0_4] : memref<64x32xbf16, #tpu.memory_space<vmem>>, vector<64x32xbf16>
    %c0_5 = arith.constant 0 : index
    %c0_6 = arith.constant 0 : index
    %4 = vector.load %arg2[%c0_5, %c0_6] : memref<32x16xbf16, #tpu.memory_space<vmem>>, vector<32x16xbf16>
    %cst_7 = arith.constant dense<0.000000e+00> : vector<64x16xf32>
    %5 = tpu.matmul %3, %4, %cst_7 {dimension_numbers = #tpu.dot_dimension_numbers<[1], [0], [0], [1], [0, 0, 1, 1], [], []>} : vector<64x32xbf16>, vector<32x16xbf16>, vector<64x16xf32> -> vector<64x16xf32>
    %6 = arith.truncf %2 : vector<16x64xf32> to vector<16x64xbf16>
    %7 = arith.truncf %5 : vector<64x16xf32> to vector<64x16xbf16>
    %c0_8 = arith.constant 0 : index
    %c0_9 = arith.constant 0 : index
    %c0_10 = arith.constant 0 : index
    %8 = vector.load %arg5[%c0_8, %c0_9, %c0_10] : memref<1x1x16xf32, #tpu.memory_space<vmem>>, vector<1x1x16xf32>
    %9 = vector.shape_cast %8 : vector<1x1x16xf32> to vector<1x16xf32>
    %c0_11 = arith.constant 0 : index
    %c0_12 = arith.constant 0 : index
    %c0_13 = arith.constant 0 : index
    %10 = vector.load %arg6[%c0_11, %c0_12, %c0_13] : memref<1x16x1xf32, #tpu.memory_space<vmem>>, vector<1x16x1xf32>
    %11 = vector.shape_cast %10 : vector<1x16x1xf32> to vector<16x1xf32>
    %12 = vector.broadcast %11 : vector<16x1xf32> to vector<16x16xf32>
    %13 = vector.broadcast %9 : vector<1x16xf32> to vector<16x16xf32>
    %14 = arith.cmpf oeq, %12, %13 : vector<16x16xf32>
    %cst_14 = arith.constant 0.000000e+00 : f32
    %15 = vector.broadcast %cst_14 : f32 to vector<16x1xf32>
    %16 = arith.cmpf oge, %11, %15 : vector<16x1xf32>
    %cst_15 = arith.constant 8.000000e+00 : f32
    %17 = math.log %cst_15 : f32
    %cst_16 = arith.constant -2.500000e+05 : f32
    %18 = arith.addf %cst_16, %17 : f32
    %cst_17 = arith.constant 0.000000e+00 : f32
    %19 = vector.broadcast %cst_17 : f32 to vector<16x1xf32>
    %20 = vector.extract_strided_slice %6 {offsets = [0, 0], sizes = [16, 16], strides = [1, 1]} : vector<16x64xbf16> to vector<16x16xbf16>
    %21 = vector.extract_strided_slice %7 {offsets = [0, 0], sizes = [16, 16], strides = [1, 1]} : vector<64x16xbf16> to vector<16x16xbf16>
    %cst_18 = arith.constant dense<0.000000e+00> : vector<16x16xf32>
    %22 = tpu.matmul %20, %21, %cst_18 {dimension_numbers = #tpu.dot_dimension_numbers<[1], [0], [0], [1], [0, 0, 1, 1], [], []>} : vector<16x16xbf16>, vector<16x16xbf16>, vector<16x16xf32> -> vector<16x16xf32>
    %cst_19 = arith.constant -2.500000e+05 : f32
    %23 = vector.broadcast %cst_19 : f32 to vector<16x16xf32>
    %24 = arith.select %14, %22, %23 : vector<16x16xi1>, vector<16x16xf32>
    %cst_20 = arith.constant dense<0xFF800000> : vector<16xf32>
    %25 = vector.multi_reduction <maximumf>, %24, %cst_20 [1] : vector<16x16xf32> to vector<16xf32>
    %26 = vector.shape_cast %25 : vector<16xf32> to vector<16x1xf32>
    %27 = vector.broadcast %26 : vector<16x1xf32> to vector<16x16xf32>
    %28 = arith.subf %24, %27 : vector<16x16xf32>
    %29 = math.exp %28 : vector<16x16xf32>
    %cst_21 = arith.constant dense<0.000000e+00> : vector<16xf32>
    %30 = vector.multi_reduction <add>, %29, %cst_21 [1] : vector<16x16xf32> to vector<16xf32>
    %31 = vector.shape_cast %30 : vector<16xf32> to vector<16x1xf32>
    %32 = math.log %31 : vector<16x1xf32>
    %33 = arith.addf %26, %32 : vector<16x1xf32>
    %34 = vector.broadcast %18 : f32 to vector<16x1xf32>
    %35 = arith.select %16, %33, %34 : vector<16x1xi1>, vector<16x1xf32>
    %36 = arith.addf %19, %35 : vector<16x1xf32>
    %37 = vector.extract_strided_slice %6 {offsets = [0, 16], sizes = [16, 16], strides = [1, 1]} : vector<16x64xbf16> to vector<16x16xbf16>
    %38 = vector.extract_strided_slice %7 {offsets = [16, 0], sizes = [16, 16], strides = [1, 1]} : vector<64x16xbf16> to vector<16x16xbf16>
    %cst_22 = arith.constant dense<0.000000e+00> : vector<16x16xf32>
    %39 = tpu.matmul %37, %38, %cst_22 {dimension_numbers = #tpu.dot_dimension_numbers<[1], [0], [0], [1], [0, 0, 1, 1], [], []>} : vector<16x16xbf16>, vector<16x16xbf16>, vector<16x16xf32> -> vector<16x16xf32>
    %cst_23 = arith.constant -2.500000e+05 : f32
    %40 = vector.broadcast %cst_23 : f32 to vector<16x16xf32>
    %41 = arith.select %14, %39, %40 : vector<16x16xi1>, vector<16x16xf32>
    %cst_24 = arith.constant dense<0xFF800000> : vector<16xf32>
    %42 = vector.multi_reduction <maximumf>, %41, %cst_24 [1] : vector<16x16xf32> to vector<16xf32>
    %43 = vector.shape_cast %42 : vector<16xf32> to vector<16x1xf32>
    %44 = vector.broadcast %43 : vector<16x1xf32> to vector<16x16xf32>
    %45 = arith.subf %41, %44 : vector<16x16xf32>
    %46 = math.exp %45 : vector<16x16xf32>
    %cst_25 = arith.constant dense<0.000000e+00> : vector<16xf32>
    %47 = vector.multi_reduction <add>, %46, %cst_25 [1] : vector<16x16xf32> to vector<16xf32>
    %48 = vector.shape_cast %47 : vector<16xf32> to vector<16x1xf32>
    %49 = math.log %48 : vector<16x1xf32>
    %50 = arith.addf %43, %49 : vector<16x1xf32>
    %51 = vector.broadcast %18 : f32 to vector<16x1xf32>
    %52 = arith.select %16, %50, %51 : vector<16x1xi1>, vector<16x1xf32>
    %53 = arith.addf %36, %52 : vector<16x1xf32>
    %54 = vector.extract_strided_slice %6 {offsets = [0, 32], sizes = [16, 16], strides = [1, 1]} : vector<16x64xbf16> to vector<16x16xbf16>
    %55 = vector.extract_strided_slice %7 {offsets = [32, 0], sizes = [16, 16], strides = [1, 1]} : vector<64x16xbf16> to vector<16x16xbf16>
    %cst_26 = arith.constant dense<0.000000e+00> : vector<16x16xf32>
    %56 = tpu.matmul %54, %55, %cst_26 {dimension_numbers = #tpu.dot_dimension_numbers<[1], [0], [0], [1], [0, 0, 1, 1], [], []>} : vector<16x16xbf16>, vector<16x16xbf16>, vector<16x16xf32> -> vector<16x16xf32>
    %cst_27 = arith.constant -2.500000e+05 : f32
    %57 = vector.broadcast %cst_27 : f32 to vector<16x16xf32>
    %58 = arith.select %14, %56, %57 : vector<16x16xi1>, vector<16x16xf32>
    %cst_28 = arith.constant dense<0xFF800000> : vector<16xf32>
    %59 = vector.multi_reduction <maximumf>, %58, %cst_28 [1] : vector<16x16xf32> to vector<16xf32>
    %60 = vector.shape_cast %59 : vector<16xf32> to vector<16x1xf32>
    %61 = vector.broadcast %60 : vector<16x1xf32> to vector<16x16xf32>
    %62 = arith.subf %58, %61 : vector<16x16xf32>
    %63 = math.exp %62 : vector<16x16xf32>
    %cst_29 = arith.constant dense<0.000000e+00> : vector<16xf32>
    %64 = vector.multi_reduction <add>, %63, %cst_29 [1] : vector<16x16xf32> to vector<16xf32>
    %65 = vector.shape_cast %64 : vector<16xf32> to vector<16x1xf32>
    %66 = math.log %65 : vector<16x1xf32>
    %67 = arith.addf %60, %66 : vector<16x1xf32>
    %68 = vector.broadcast %18 : f32 to vector<16x1xf32>
    %69 = arith.select %16, %67, %68 : vector<16x1xi1>, vector<16x1xf32>
    %70 = arith.addf %53, %69 : vector<16x1xf32>
    %71 = vector.extract_strided_slice %6 {offsets = [0, 48], sizes = [16, 16], strides = [1, 1]} : vector<16x64xbf16> to vector<16x16xbf16>
    %72 = vector.extract_strided_slice %7 {offsets = [48, 0], sizes = [16, 16], strides = [1, 1]} : vector<64x16xbf16> to vector<16x16xbf16>
    %cst_30 = arith.constant dense<0.000000e+00> : vector<16x16xf32>
    %73 = tpu.matmul %71, %72, %cst_30 {dimension_numbers = #tpu.dot_dimension_numbers<[1], [0], [0], [1], [0, 0, 1, 1], [], []>} : vector<16x16xbf16>, vector<16x16xbf16>, vector<16x16xf32> -> vector<16x16xf32>
    %cst_31 = arith.constant -2.500000e+05 : f32
    %74 = vector.broadcast %cst_31 : f32 to vector<16x16xf32>
    %75 = arith.select %14, %73, %74 : vector<16x16xi1>, vector<16x16xf32>
    %cst_32 = arith.constant dense<0xFF800000> : vector<16xf32>
    %76 = vector.multi_reduction <maximumf>, %75, %cst_32 [1] : vector<16x16xf32> to vector<16xf32>
    %77 = vector.shape_cast %76 : vector<16xf32> to vector<16x1xf32>
    %78 = vector.broadcast %77 : vector<16x1xf32> to vector<16x16xf32>
    %79 = arith.subf %75, %78 : vector<16x16xf32>
    %80 = math.exp %79 : vector<16x16xf32>
    %cst_33 = arith.constant dense<0.000000e+00> : vector<16xf32>
    %81 = vector.multi_reduction <add>, %80, %cst_33 [1] : vector<16x16xf32> to vector<16xf32>
    %82 = vector.shape_cast %81 : vector<16xf32> to vector<16x1xf32>
    %83 = math.log %82 : vector<16x1xf32>
    %84 = arith.addf %77, %83 : vector<16x1xf32>
    %85 = vector.broadcast %18 : f32 to vector<16x1xf32>
    %86 = arith.select %16, %84, %85 : vector<16x1xi1>, vector<16x1xf32>
    %87 = arith.addf %70, %86 : vector<16x1xf32>
    %88 = vector.shape_cast %87 : vector<16x1xf32> to vector<1x16x1xf32>
    %cst_34 = arith.constant dense<0.000000e+00> : vector<1xf32>
    %89 = vector.multi_reduction <add>, %88, %cst_34 [1, 2] : vector<1x16x1xf32> to vector<1xf32>
    %90 = vector.shape_cast %89 : vector<1xf32> to vector<1x1x1xf32>
    %91 = vector.extract %90[0, 0, 0] : f32 from vector<1x1x1xf32>
    %cst_35 = arith.constant -4.000000e+00 : f32
    %92 = arith.mulf %cst_35, %91 : f32
    %93 = vector.broadcast %92 : f32 to vector<8x128xf32>
    %c0_36 = arith.constant 0 : index
    %c0_37 = arith.constant 0 : index
    %c0_38 = arith.constant 0 : index
    %94 = vector.load %arg7[%c0_36, %c0_37, %c0_38] : memref<1x8x128xf32, #tpu.memory_space<vmem>>, vector<1x8x128xf32>
    %95 = vector.shape_cast %94 : vector<1x8x128xf32> to vector<8x128xf32>
    %96 = vector.shape_cast %93 : vector<8x128xf32> to vector<1x8x128xf32>
    tpu.vector_store %arg7[%c0_36, %c0_37, %c0_38], %96 {strides = array<i32>} : memref<1x8x128xf32, #tpu.memory_space<vmem>>, vector<1x8x128xf32>,
    return
  }
  func.func @transform_0(%arg0: i32) -> (i32, i32) {
    %c0_i32 = arith.constant 0 : i32
    %c0_i32_0 = arith.constant 0 : i32
    return %arg0, %c0_i32 : i32, i32
  }
  func.func @transform_1(%arg0: i32) -> (i32, i32) {
    %c0_i32 = arith.constant 0 : i32
    %c0_i32_0 = arith.constant 0 : i32
    return %c0_i32, %arg0 : i32, i32
  }
  func.func @transform_2(%arg0: i32) -> (i32, i32) {
    %c0_i32 = arith.constant 0 : i32
    %c0_i32_0 = arith.constant 0 : i32
    %c0_i32_1 = arith.constant 0 : i32
    return %c0_i32, %c0_i32_0 : i32, i32
  }
  func.func @transform_3(%arg0: i32) -> (i32, i32) {
    %c0_i32 = arith.constant 0 : i32
    %c0_i32_0 = arith.constant 0 : i32
    %c0_i32_1 = arith.constant 0 : i32
    return %c0_i32, %c0_i32_0 : i32, i32
  }
  func.func @transform_4(%arg0: i32) -> (i32, i32, i32) {
    %c0_i32 = arith.constant 0 : i32
    %c0_i32_0 = arith.constant 0 : i32
    %c0_i32_1 = arith.constant 0 : i32
    return %arg0, %c0_i32, %c0_i32_0 : i32, i32, i32
  }
  func.func @transform_5(%arg0: i32) -> (i32, i32, i32) {
    %c0_i32 = arith.constant 0 : i32
    %c0_i32_0 = arith.constant 0 : i32
    %c0_i32_1 = arith.constant 0 : i32
    return %arg0, %c0_i32, %c0_i32_0 : i32, i32, i32
  }
  func.func @transform_6(%arg0: i32) -> (i32, i32, i32) {
    %c0_i32 = arith.constant 0 : i32
    %c0_i32_0 = arith.constant 0 : i32
    %c0_i32_1 = arith.constant 0 : i32
    return %arg0, %c0_i32, %c0_i32_0 : i32, i32, i32
  }
}

</mosaic_0001>

<bundles_post_ra>
// kernel: tpu_custom_call.1
= control target key start
LH: loop header
LB: loop body
LE: loop exit
PB: predicated region body
PF: predicated region fallthrough
CT: control target
= control target key end

     0   :  { %v730_v1 = vmov 0.0   ;;  %vm731_vm0 = vmmov 0   ;;  %vm48_vm1 = vcmask 261120   ;;  %s916_s0 = inlined_call_operand.vmem [shape: bf16[16,32], index: 0, kind: input, shape index: {}]   ;;  %s917_s1 = inlined_call_operand.vmem [shape: bf16[32,16], index: 1, kind: input, shape index: {}]   ;;  %s918_s2 = inlined_call_operand.vmem [shape: bf16[32,64], index: 2, kind: input, shape index: {}]   ;;  %s919_s3 = inlined_call_operand.vmem [shape: bf16[64,32], index: 3, kind: input, shape index: {}]   ;;  %s920_s4 = inlined_call_operand.vmem [shape: f32[1,1,16], index: 4, kind: input, shape index: {}]   ;;  %s921_s5 = inlined_call_operand.vmem [shape: f32[1,16,1], index: 5, kind: input, shape index: {}]   ;;  %s922_s6 = inlined_call_operand.hbm [shape: f32[1,8,128], index: 6, kind: output, shape index: {}]  }
   0x1   :  { %v667_v0 = vld [vmem:[%s918_s2 + $0x8] sm:$0xff]   ;;  %612 = vmatprep.subr.bf16.mxu0 %v730_v1  ;;  %v669_v3 = vld [vmem:[%s918_s2] sm:$0xff]   ;;  %616 = vmatprep.mubr.msk.bf16.mxu0 %vm731_vm0, %v730_v1  ;;  %v674_v8 = vld [vmem:[%s919_s3 + $0x10] sm:$0xff]  }
   0x2   :  { %v668_v2 = vld [vmem:[%s917_s1 + $0x8] sm:$0xff]   ;;  %613 = vmatpush3.bf16.msra.mxu0 %v667_v0  ;;  %v670_v4 = vld [vmem:[%s917_s1] sm:$0xff]  }
   0x3   :  { %620 = vmatprep.subr.bf16.mxu1 %v668_v2  ;;  %614 = vmatprep.subr.bf16.mxu0 %v730_v1  ;;  %v671_v5 = vld [vmem:[%s916_s0] sm:$0xff]   ;;  %v673_v7 = vld [vmem:[%s919_s3 + $0x8] sm:$0xff]  }
   0x4   :  { %621 = vmatpush3.bf16.msra.mxu1 %v668_v2  ;;  %v672_v6 = vld [vmem:[%s919_s3] sm:$0xff]  }
   0x5   :  { %622 = vmatprep.subr.bf16.mxu1 %v670_v4  ;;  %624 = vmatprep.mubr.msk.bf16.mxu1 %vm48_vm1, %v672_v6 }
   0x6   :  { %615 = vmatpush3.bf16.msra.mxu0 %v669_v3 }
   0x7   :  { %632 = vmatprep.subr.bf16.mxu0 %v730_v1 }
   0x8   :  { %623 = vmatpush3.bf16.msra.mxu1 %v670_v4 }
   0x9   :  { %617 = vmatmul.mubr.msk.bf16.vlgmr.msra.gmra.mxu0 %vm48_vm1, %v671_v5  ;;  %644 = vmatprep.subr.bf16.mxu1 %v730_v1 }
   0xa   :  { %11 = vsyncpa [#allocation3], 0  ;;  %634 = vmatprep.mubr.msk.bf16.mxu0 %vm731_vm0, %v730_v1  ;;  %v675_v9 = vld [vmem:[%s919_s3 + $0x18] sm:$0xff]   ;;  %v732_v10 = vmov 0   ;;  %s733_s12 = smov 80   ;;  %s734_s13 = smov 112  }
   0xb   :  { %625 = vmatmul.mubr.msk.bf16.vlgmr.msra.gmra.mxu1 %vm48_vm1, %v673_v7  ;;  %665 = vset.pattern.permute.xlu1 %v732_v10  ;;  %v817_v21 = vld [vmem:[%s921_s5] sm:$0xff]  ;;  %s735_s15 = smov 96   ;;  %vm242_vm2 = vcmask 130048   ;;  %v823_v24 = vld [vmem:[%s921_s5 + $0x8] sm:$0xff]  ;;  %vm546_vm7 = vcmask 7168  }
   0xc   :  { %628 = vmatprep.mubr.msk.bf16.mxu1 %vm48_vm1, %v674_v8  ;;  %666 = vset.pattern.permute.xlu0 %v732_v10  ;;  %v590_v33 = vld [vmem:[%s920_s4] ss:$0 sm:$0xff]  ;;  %vm240_vm5 = vcmp.ge.f32.partialorder %v817_v21, 0.0  ;;  %vm241_vm6 = vcmp.ge.f32.partialorder %v823_v24, 0.0  ;;  %s736_s4 = smov [#allocation2]  }
   0xd   :  { %s568_s19 = sshll.u32 %s736_s4, 4  ;;  %s569_s19 = int_to_ptr.vmem [resolvable:$true] %s568_s19 }
   0xe   :  { %s708_s22 = scalar_lea.vmem %s569_s19, 128  ;;  %p713_p1 = scmp.lt.s32.totalorder %s569_s19, %s569_s19 }
   0xf   :  { %p709_p0 = scmp.ne.s32.totalorder %s569_s19, %s708_s22  ;;  %p714_p2 = scmp.lt.s32.totalorder %s708_s22, %s708_s22 }
  0x11   :  { %p715_p3 = por %p714_p2, %p713_p1 }
  0x13   :  { %629 = vmatmul.mubr.msk.bf16.gmra.mxu1 %vm48_vm1, %v675_v9  ;;  %p716_p4 = pnand %p715_p3, %p709_p0 }
  0x14   :  { %646 = vmatprep.mubr.msk.bf16.mxu1 %vm731_vm0, %v730_v1 }
  0xc9   :  { %v86_v11 = vpop.f32.mrf.mxu0 }
  0xcb   :  { %v626_v12 = vpop.f32.mrf.mxu1  ;;  %v618_v13 = vpop.f32.mrf.mxu0 }
  0xcd   :  { %v183_v14 = vpop.f32.mrf.mxu1  ;;  %v89_v15 = vpop.f32.mrf.mxu0 }
  0xce   :  { %v214_v16 = vpack.c.bf16 %v89_v15, %v86_v11 }
  0xcf   :  { %v627_v17 = vpop.f32.mrf.mxu1  ;;  %v619_v18 = vpop.f32.mrf.mxu0 }
  0xd0   :  { %470 = vrot.lane.b32.xlu1 %v214_v16, %s733_s12  ;;  %318 = vrot.lane.b32.xlu0 %v214_v16, %s734_s13  ;;  %v216_v23 = vpack.c.bf16 %v627_v17, %v626_v12 }
  0xd1   :  { %v186_v19 = vpop.f32.mrf.mxu1 }
  0xd2   :  { %v215_v20 = vpack.c.bf16 %v186_v19, %v183_v14 }
  0xd3   :  { %v630_v22 = vpop.f32.mrf.mxu1 }
  0xd4   :  { %633 = vmatpush3.bf16.msra.mxu0 %v215_v20  ;;  %394 = vrot.lane.b32.xlu0 %v214_v16, %s735_s15 }
  0xd5   :  { %224 = vperm.xlu1 %665, %v817_v21   ;;  %638 = vmatprep.subr.bf16.mxu0 %v730_v1  ;;  %v199_v25 = vpop.f32.mrf.mxu1 }
  0xd7   :  { %635 = vmatmul.mubr.msk.bf16.vlgmr.msra.gmra.mxu0 %vm242_vm2, %v214_v16  ;;  %v631_v26 = vpop.f32.mrf.mxu1 }
  0xd8   :  { %229 = vperm.xlu0 %666, %v823_v24   ;;  %639 = vmatpush3.bf16.msra.mxu0 %v216_v23  ;;  %v218_v27 = vpack.c.bf16 %v631_v26, %v630_v22 }
  0xd9   :  { %v202_v28 = vpop.f32.mrf.mxu1  ;;  %640 = vmatprep.mubr.msk.bf16.mxu0 %vm731_vm0, %v730_v1  ;;  %650 = vmatprep.subr.bf16.mxu0 %v730_v1 }
  0xda   :  { %v217_v29 = vpack.c.bf16 %v202_v28, %v199_v25 }
  0xdc   :  { %645 = vmatpush3.bf16.msra.mxu1 %v217_v29 }
 0x142   :  { %v319_v30 = vpop.permute.xlu0 %318  ;;  %v471_v32 = vpop.permute.xlu1 %470 }
 0x143   :  { %641 = vmatmul.mubr.msk.bf16.vlgmr.msra.gmra.mxu0 %vm242_vm2, %v319_v30 }
 0x144   :  { %651 = vmatpush3.bf16.msra.mxu0 %v218_v27  ;;  %652 = vmatprep.mubr.msk.bf16.mxu0 %vm731_vm0, %v730_v1 }
 0x146   :  { %v395_v31 = vpop.permute.xlu0 %394 }
 0x147   :  { %647 = vmatmul.mubr.msk.bf16.vlgmr.msra.gmra.mxu1 %vm242_vm2, %v395_v31 }
 0x14b   :  { %653 = vmatmul.mubr.msk.bf16.vlgmr.msra.gmra.mxu0 %vm242_vm2, %v471_v32 }
 0x150   :  { %v225_v34 = vpop.permute.xlu1 %224 }
 0x151   :  { %vm238_vm3 = vcmp.eq.f32.partialorder %v225_v34, %v590_v33 }
 0x153   :  { %v230_v35 = vpop.permute.xlu0 %229 }
 0x154   :  { %vm239_vm4 = vcmp.eq.f32.partialorder %v230_v35, %v590_v33 }
 0x197   :  { %v280_v36 = vpop.f32.mrf.mxu0 }
 0x198   :  { %v287_v37 = vsel %vm238_vm3, %v280_v36, -250000.0 }
 0x199   :  { %v636_v38 = vpop.f32.mrf.mxu0  ;;  %v289_v39 = vsel %vm242_vm2, %v287_v37, -inf }
 0x19a   :  { %290 = vmax.xlane.f32.xlu1 %v289_v39 }
 0x19b   :  { %v283_v40 = vpop.f32.mrf.mxu0 }
 0x19c   :  { %v288_v41 = vsel %vm239_vm4, %v283_v40, -250000.0 }
 0x19d   :  { %v637_v42 = vpop.f32.mrf.mxu0  ;;  %v292_v43 = vsel %vm242_vm2, %v288_v41, -inf }
 0x19e   :  { %293 = vmax.xlane.f32.xlu0 %v292_v43 }
 0x203   :  { %v357_v44 = vpop.f32.mrf.mxu0 }
 0x204   :  { %v364_v45 = vsel %vm238_vm3, %v357_v44, -250000.0 }
 0x205   :  { %v642_v46 = vpop.f32.mrf.mxu0  ;;  %v366_v47 = vsel %vm242_vm2, %v364_v45, -inf }
 0x206   :  { %367 = vmax.xlane.f32.xlu1 %v366_v47 }
 0x207   :  { %v360_v48 = vpop.f32.mrf.mxu0  ;;  %v433_v49 = vpop.f32.mrf.mxu1 }
 0x208   :  { %v365_v50 = vsel %vm239_vm4, %v360_v48, -250000.0  ;;  %v440_v51 = vsel %vm238_vm3, %v433_v49, -250000.0 }
 0x209   :  { %v643_v52 = vpop.f32.mrf.mxu0  ;;  %v648_v53 = vpop.f32.mrf.mxu1  ;;  %v442_v54 = vsel %vm242_vm2, %v440_v51, -inf  ;;  %v369_v55 = vsel %vm242_vm2, %v365_v50, -inf }
 0x20a   :  { %443 = vmax.xlane.f32.xlu1 %v442_v54  ;;  %370 = vmax.xlane.f32.xlu0 %v369_v55 }
 0x20b   :  { %v436_v56 = vpop.f32.mrf.mxu1  ;;  %v509_v57 = vpop.f32.mrf.mxu0 }
 0x20c   :  { %v441_v58 = vsel %vm239_vm4, %v436_v56, -250000.0  ;;  %v516_v59 = vsel %vm238_vm3, %v509_v57, -250000.0 }
 0x20d   :  { %v649_v60 = vpop.f32.mrf.mxu1  ;;  %v654_v61 = vpop.f32.mrf.mxu0  ;;  %v445_v62 = vsel %vm242_vm2, %v441_v58, -inf  ;;  %v518_v63 = vsel %vm242_vm2, %v516_v59, -inf }
 0x20e   :  { %446 = vmax.xlane.f32.xlu0 %v445_v62  ;;  %519 = vmax.xlane.f32.xlu1 %v518_v63 }
 0x20f   :  { %v512_v0 = vpop.f32.mrf.mxu0 }
 0x210   :  { %v517_v1 = vsel %vm239_vm4, %v512_v0, -250000.0 }
 0x211   :  { %v655_v2 = vpop.f32.mrf.mxu0  ;;  %v521_v3 = vsel %vm242_vm2, %v517_v1, -inf }
 0x212   :  { %522 = vmax.xlane.f32.xlu0 %v521_v3 }
 0x223   :  { %v855_v4 = vpop.xlane.xlu1 %290 }
 0x224   :  { %v295_v5 = vsub.f32 %v287_v37, %v855_v4 }
 0x226   :  { %v297_v6 = vmul.f32 1.442695, %v295_v5 }
 0x227   :  { %v858_v7 = vpop.xlane.xlu0 %293 }
 0x228   :  { %676 = vpow2.f32 %v297_v6  ;;  %v296_v8 = vsub.f32 %v288_v41, %v858_v7 }
 0x22a   :  { %v299_v9 = vmul.f32 1.442695, %v296_v8 }
 0x22c   :  { %678 = vpow2.f32 %v299_v9 }
 0x235   :  { %v677_v10 = vpop.eup %676 }
 0x236   :  { %v301_v11 = vsel %vm242_vm2, %v677_v10, 0.0 }
 0x237   :  { %302 = vadd.xlane.f32.xlu1 %v301_v11 }
 0x239   :  { %v679_v12 = vpop.eup %678 }
 0x23a   :  { %v304_v13 = vsel %vm242_vm2, %v679_v12, 0.0 }
 0x23b   :  { %305 = vadd.xlane.f32.xlu0 %v304_v13 }
 0x28f   :  { %v863_v14 = vpop.xlane.xlu1 %367 }
 0x290   :  { %v372_v15 = vsub.f32 %v364_v45, %v863_v14 }
 0x292   :  { %v374_v16 = vmul.f32 1.442695, %v372_v15 }
 0x293   :  { %v866_v17 = vpop.xlane.xlu1 %443  ;;  %v868_v18 = vpop.xlane.xlu0 %370 }
 0x294   :  { %680 = vpow2.f32 %v374_v16  ;;  %v448_v19 = vsub.f32 %v440_v51, %v866_v17  ;;  %v373_v20 = vsub.f32 %v365_v50, %v868_v18 }
 0x296   :  { %v450_v22 = vmul.f32 1.442695, %v448_v19  ;;  %v376_v23 = vmul.f32 1.442695, %v373_v20 }
 0x297   :  { %v872_v25 = vpop.xlane.xlu0 %446  ;;  %v874_v26 = vpop.xlane.xlu1 %519 }
 0x298   :  { %682 = vpow2.f32 %v450_v22  ;;  %v449_v27 = vsub.f32 %v441_v58, %v872_v25  ;;  %v524_v28 = vsub.f32 %v516_v59, %v874_v26 }
 0x299   :  { %684 = vpow2.f32 %v376_v23 }
 0x29a   :  { %v452_v29 = vmul.f32 1.442695, %v449_v27  ;;  %v526_v30 = vmul.f32 1.442695, %v524_v28 }
 0x29b   :  { %v878_v31 = vpop.xlane.xlu0 %522 }
 0x29c   :  { %686 = vpow2.f32 %v452_v29  ;;  %v525_v32 = vsub.f32 %v517_v1, %v878_v31 }
 0x29d   :  { %688 = vpow2.f32 %v526_v30 }
 0x29e   :  { %v528_v33 = vmul.f32 1.442695, %v525_v32 }
 0x2a0   :  { %690 = vpow2.f32 %v528_v33 }
 0x2a1   :  { %v681_v34 = vpop.eup %680 }
 0x2a2   :  { %v378_v35 = vsel %vm242_vm2, %v681_v34, 0.0 }
 0x2a3   :  { %379 = vadd.xlane.f32.xlu1 %v378_v35 }
 0x2a5   :  { %v683_v36 = vpop.eup %682 }
 0x2a6   :  { %v685_v37 = vpop.eup %684  ;;  %v454_v38 = vsel %vm242_vm2, %v683_v36, 0.0 }
 0x2a7   :  { %455 = vadd.xlane.f32.xlu1 %v454_v38  ;;  %v381_v39 = vsel %vm242_vm2, %v685_v37, 0.0 }
 0x2a8   :  { %382 = vadd.xlane.f32.xlu0 %v381_v39 }
 0x2a9   :  { %v687_v40 = vpop.eup %686 }
 0x2aa   :  { %v689_v41 = vpop.eup %688  ;;  %v457_v42 = vsel %vm242_vm2, %v687_v40, 0.0 }
 0x2ab   :  { %v530_v43 = vsel %vm242_vm2, %v689_v41, 0.0 }
 0x2ac   :  { %531 = vadd.xlane.f32.xlu1 %v530_v43  ;;  %458 = vadd.xlane.f32.xlu0 %v457_v42 }
 0x2ad   :  { %v691_v44 = vpop.eup %690 }
 0x2ae   :  { %v533_v45 = vsel %vm242_vm2, %v691_v44, 0.0 }
 0x2b0   :  { %534 = vadd.xlane.f32.xlu0 %v533_v45 }
 0x2c0   :  { %v303_v46 = vpop.xlane.xlu1 %302 }
 0x2c4   :  { %v306_v48 = vpop.xlane.xlu0 %305 }
 0x32c   :  { %v380_v47 = vpop.xlane.xlu1 %379 }
 0x32d   :  { %692 = vlog2.f32 %v380_v47 }
 0x32e   :  { %694 = vlog2.f32 %v303_v46 }
 0x32f   :  { %696 = vlog2.f32 %v306_v48 }
 0x330   :  { %v456_v49 = vpop.xlane.xlu1 %455 }
 0x331   :  { %698 = vlog2.f32 %v456_v49  ;;  %v383_v50 = vpop.xlane.xlu0 %382 }
 0x332   :  { %700 = vlog2.f32 %v383_v50 }
 0x335   :  { %v532_v51 = vpop.xlane.xlu1 %531  ;;  %v459_v52 = vpop.xlane.xlu0 %458 }
 0x336   :  { %702 = vlog2.f32 %v532_v51 }
 0x337   :  { %704 = vlog2.f32 %v459_v52 }
 0x339   :  { %v535_v53 = vpop.xlane.xlu0 %534 }
 0x33a   :  { %v693_v54 = vpop.eup %692  ;;  %706 = vlog2.f32 %v535_v53 }
 0x33b   :  { %v695_v55 = vpop.eup %694  ;;  %v385_v56 = vmul.f32 0.6931472, %v693_v54 }
 0x33c   :  { %v697_v57 = vpop.eup %696  ;;  %v308_v59 = vmul.f32 0.6931472, %v695_v55 }
 0x33d   :  { %v310_v62 = vmul.f32 0.6931472, %v697_v57  ;;  %v388_v63 = vadd.f32 %v385_v56, %v863_v14 }
 0x33e   :  { %v699_v58 = vpop.eup %698  ;;  %v311_v1 = vadd.f32 %v308_v59, %v855_v4 }
 0x33f   :  { %v701_v60 = vpop.eup %700  ;;  %v461_v61 = vmul.f32 0.6931472, %v699_v58  ;;  %v312_v8 = vadd.f32 %v310_v62, %v858_v7  ;;  %v390_v9 = vsel %vm240_vm5, %v388_v63, -249997.92 }
 0x340   :  { %v387_v0 = vmul.f32 0.6931472, %v701_v60  ;;  %v313_v4 = vsel %vm240_vm5, %v311_v1, -249997.92 }
 0x341   :  { %v464_v2 = vadd.f32 %v461_v61, %v866_v17  ;;  %v392_v16 = vadd.f32 %v390_v9, %v313_v4  ;;  %v314_v17 = vsel %vm241_vm6, %v312_v8, -249997.92 }
 0x342   :  { %v389_v3 = vadd.f32 %v387_v0, %v868_v18 }
 0x343   :  { %v703_v5 = vpop.eup %702  ;;  %v466_v14 = vsel %vm240_vm5, %v464_v2, -249997.92 }
 0x344   :  { %v705_v6 = vpop.eup %704  ;;  %v537_v10 = vmul.f32 0.6931472, %v703_v5  ;;  %v391_v12 = vsel %vm241_vm6, %v389_v3, -249997.92  ;;  %v468_v23 = vadd.f32 %v466_v14, %v392_v16 }
 0x345   :  { %v463_v11 = vmul.f32 0.6931472, %v705_v6  ;;  %v393_v20 = vadd.f32 %v391_v12, %v314_v17 }
 0x346   :  { %v540_v13 = vadd.f32 %v537_v10, %v874_v26 }
 0x347   :  { %v707_v15 = vpop.eup %706  ;;  %v465_v7 = vadd.f32 %v463_v11, %v872_v25 }
 0x348   :  { %v539_v18 = vmul.f32 0.6931472, %v707_v15  ;;  %v542_v19 = vsel %vm240_vm5, %v540_v13, -249997.92 }
 0x349   :  { %v467_v22 = vsel %vm241_vm6, %v465_v7, -249997.92  ;;  %v544_v28 = vadd.f32 %v542_v19, %v468_v23 }
 0x34a   :  { %v541_v26 = vadd.f32 %v539_v18, %v878_v31  ;;  %v469_v27 = vadd.f32 %v467_v22, %v393_v20 }
 0x34b   :  { %v547_v30 = vsel %vm546_vm7, %v544_v28, 0.0 }
 0x34c   :  { %v543_v25 = vsel %vm241_vm6, %v541_v26, -249997.92 }
 0x34d   :  { %v545_v29 = vadd.f32 %v543_v25, %v469_v27 }
 0x34f   :  { %v548_v32 = vsel %vm546_vm7, %v545_v29, 0.0 }
 0x350   :  { %v549_v33 = vadd.f32 %v548_v32, %v547_v30 }
 0x352   :  { %550 = vadd.xlane.f32.xlu1 %v549_v33 }
 0x3db   :  { %v551_v21 = vpop.xlane.xlu1 %550 }
 0x3dc   :  { %v552_v34 = vrot.slane %v551_v21, 4 }
 0x3de   :  { %v553_v35 = vadd.f32 %v552_v34, %v551_v21 }
 0x3e0   :  { %v554_v36 = vrot.slane %v553_v35, 2 }
 0x3e2   :  { %v555_v37 = vadd.f32 %v554_v36, %v553_v35 }
 0x3e4   :  { %v556_v38 = vrot.slane %v555_v37, 1 }
 0x3e6   :  { %v557_v39 = vadd.f32 %v556_v38, %v555_v37 }
 0x3e8   :  { %656 = vpush %v557_v39 }
 0x419   :  { %s657_s20 = spop %656 }
 0x41a   :  { %s559_s21 = smul.f32 -4.0, %s657_s20 }
 0x41c   :  { %v560_v24 = vstv %s559_s21 }
 0x41d   :  { %561 = vst [vmem:[#allocation2] sm:$0xff] %v560_v24 }
 0x41e   :  { %719 = shalt.err (!%p716_p4)
}
 0x41f   :  { %571 = dma.vmem_to_hbm [thread:$0]  %s569_s19, 128, %s922_s6, [#allocation3]  }
 0x420   :  { %728 = dma.done.wait [#allocation3], 128  }
 0x421   :  { %729 = vsyncadd [#allocation3], 4294967168 }
 0x422   :  { %575 = vsyncpa [#allocation3], 1 }

</bundles_post_ra>
